<compile_context>
chip_gen: v6e
topology: v6e:2x2x1
jax: 0.10.0
libtpu: 0.0.40
codegen_flags: <defaults>
</compile_context>

<pallas_src>
import functools
import math

import jax
import jax.numpy as jnp
from jax import lax
from jax.experimental import pallas as pl
from jax.experimental.pallas import tpu as pltpu

LANE = 128
BN_EPS = 1e-5


def _round_up(v, m):
    return ((v + m - 1) // m) * m


def _gelu(x):
    # tanh approximation (PyTorch nn.GELU is erf-based; difference ~1e-3).
    c = math.sqrt(2.0 / math.pi)
    return 0.5 * x * (1.0 + jnp.tanh(c * (x + 0.044715 * x * x * x)))


# --------------------------------------------------------------------------
# Pallas kernels
# --------------------------------------------------------------------------

def _fc1_kernel(x_ref, w_ref, b_ref, o_ref):
    """Grapher.fc1: per-token 1x1 conv with folded eval-mode BN.
    bf16 operands on the MXU, f32 accumulation, f32 output."""
    y = jnp.dot(x_ref[...], w_ref[...], preferred_element_type=jnp.float32)
    o_ref[...] = (y + b_ref[...]).astype(o_ref.dtype)


def _vig_tail_kernel(nbr_ref,                       # SMEM scalar prefetch
                     y1_ref, xs_ref,
                     wga_ref, wgb_ref, bg_ref,
                     w2_ref, b2_ref,
                     wl1_ref, bl1_ref,
                     wl2_ref, bl2_ref,
                     es_ref,                        # SMEM (2,) f32
                     o_ref, mr_ref, *, tm, k):
    """Fused: kNN gather + max-relative, graph-conv 1x1 (+folded BN) + GELU,
    fc2 (+folded BN) + shortcut, expmap0, two LorentzLinear layers,
    residual add, logmap0 - one HBM pass over the activations."""
    f32 = jnp.float32
    bf16 = jnp.bfloat16
    base = pl.multiple_of(pl.program_id(0) * tm, tm)

    # --- kNN gather + running max over neighbours (scalar-prefetched idx) ---
    def gather_row(r, carry):
        off = (base + r) * k
        acc = y1_ref[pl.ds(nbr_ref[off], 1), :]
        for j in range(1, k):
            acc = jnp.maximum(acc, y1_ref[pl.ds(nbr_ref[off + j], 1), :])
        mr_ref[pl.ds(r, 1), :] = acc
        return carry

    lax.fori_loop(0, tm, gather_row, 0)

    y1_t = y1_ref[pl.ds(base, tm), :]          # (tm, cpad) f32 (own tile rows)
    mr = mr_ref[...] - y1_t                    # max-relative features, f32
    cpad = y1_t.shape[-1]

    tmask = lax.broadcasted_iota(jnp.int32, (tm, cpad), 1) == 0  # time lane

    def time_col(v):                           # (tm, 1) time coordinate
        return jnp.sum(jnp.where(tmask, v, 0.0), axis=-1, keepdims=True)

    # --- DyGraphConv2d 1x1 conv over [x ; max_rel] + folded BN, then GELU ---
    g = jnp.dot(y1_t.astype(bf16), wga_ref[...], preferred_element_type=f32)
    g = g + jnp.dot(mr.astype(bf16), wgb_ref[...], preferred_element_type=f32)
    g = _gelu(g + bg_ref[...])

    # --- Grapher.fc2 (1x1 conv + folded BN) + shortcut ---
    gr = (jnp.dot(g.astype(bf16), w2_ref[...], preferred_element_type=f32)
          + b2_ref[...] + xs_ref[...].astype(f32))

    # --- to_lorentz: expmap0 at the origin (Lorentz manifold, k = 1) ---
    t0 = time_col(gr)
    sp_sq = jnp.sum(gr * gr, axis=-1, keepdims=True) - t0 * t0
    nrm = jnp.sqrt(jnp.maximum(sp_sq, 1e-15))
    e_p = jnp.exp(nrm)
    e_m = jnp.exp(-nrm)
    xl = jnp.where(tmask, 0.5 * (e_p + e_m), gr * (0.5 * (e_p - e_m) / nrm))
    res = xl

    # --- FFN_Lorentz: two LorentzLinear layers (dropout identity in eval) ---
    def lorentz_linear(xin, w_ref_, b_ref_, es):
        hh = (jnp.dot(xin.astype(bf16), w_ref_[...],
                      preferred_element_type=f32) + b_ref_[...])
        t_lin = time_col(hh)                                   # (tm, 1)
        time = es / (1.0 + jnp.exp(-t_lin)) + 1.1              # (tm, 1)
        sq = jnp.maximum(
            jnp.sum(hh * hh, axis=-1, keepdims=True) - t_lin * t_lin, 1e-8)
        scl = jnp.sqrt((time * time - 1.0) / sq)               # (tm, 1)
        return jnp.where(tmask, time, hh * scl)

    xl = lorentz_linear(xl, wl1_ref, bl1_ref, es_ref[0])
    xl = lorentz_linear(xl, wl2_ref, bl2_ref, es_ref[1])
    xl = xl + res

    # --- to_euclid: logmap0 ---
    alpha = jnp.maximum(time_col(xl), 1.0 + 1e-7)
    dist = jnp.log(alpha + jnp.sqrt(alpha * alpha - 1.0))      # arccosh
    factor = dist * lax.rsqrt(jnp.maximum(alpha * alpha - 1.0, 1e-15))
    o_ref[...] = jnp.where(tmask, 0.0, xl * factor).astype(o_ref.dtype)


# --------------------------------------------------------------------------
# pallas_call wrappers
# --------------------------------------------------------------------------

def _vmem_limit_bytes():
    cap = 128 * 1024 * 1024
    try:
        cap = int(pltpu.get_tpu_info().vmem_capacity_bytes)
    except Exception:
        pass
    return int(min(cap * 3 // 4, 100 * 1024 * 1024))


def _pick_tile_m(m, *, fixed_bytes, per_row_bytes, vmem_limit,
                 tm_max=512, min_steps=4):
    """Largest token tile that fits the budget; keeps >= min_steps grid steps
    (>= 2 per v7x TensorCore) when the token count permits."""
    avail = max(vmem_limit - fixed_bytes, per_row_bytes * 16)
    tm = min(tm_max, avail // per_row_bytes, max(m, 16))
    tm = max(tm, 16)
    if m // tm < min_steps and m >= min_steps * 16:
        tm = -(-m // min_steps)
    tm = _round_up(min(tm, max(m, 16)), 16)
    return int(max(16, tm))


def _fc1_pallas(x, w, bvec, *, tm, vmem_limit, single_buffer):
    mp, cpad = x.shape

    def inv(shape):
        if single_buffer:
            return pl.BlockSpec(shape, lambda i: (0, 0),
                                pipeline_mode=pl.Buffered(1))
        return pl.BlockSpec(shape, lambda i: (0, 0))

    return pl.pallas_call(
        _fc1_kernel,
        out_shape=jax.ShapeDtypeStruct((mp, cpad), jnp.float32),
        grid_spec=pltpu.PrefetchScalarGridSpec(
            num_scalar_prefetch=0,
            grid=(mp // tm,),
            in_specs=[pl.BlockSpec((tm, cpad), lambda i: (i, 0)),
                      inv((cpad, cpad)),
                      inv((1, cpad))],
            out_specs=pl.BlockSpec((tm, cpad), lambda i: (i, 0)),
        ),
        compiler_params=pltpu.CompilerParams(
            dimension_semantics=("parallel",),
            vmem_limit_bytes=vmem_limit),
    )(x, w, bvec)


def _vig_tail_pallas(nbr_flat, y1_full, xs, pp, *, k, tm, vmem_limit,
                     single_buffer):
    mp, cpad = y1_full.shape

    def inv(shape):
        if single_buffer:
            return pl.BlockSpec(shape, lambda i, nbr: (0, 0),
                                pipeline_mode=pl.Buffered(1))
        return pl.BlockSpec(shape, lambda i, nbr: (0, 0))

    tok = pl.BlockSpec((tm, cpad), lambda i, nbr: (i, 0))
    kernel = functools.partial(_vig_tail_kernel, tm=tm, k=k)
    return pl.pallas_call(
        kernel,
        out_shape=jax.ShapeDtypeStruct((mp, cpad), jnp.float32),
        grid_spec=pltpu.PrefetchScalarGridSpec(
            num_scalar_prefetch=1,
            grid=(mp // tm,),
            in_specs=[inv((mp, cpad)),       # full y1, resident in VMEM
                      tok,                   # shortcut tile (bf16)
                      inv((cpad, cpad)), inv((cpad, cpad)), inv((1, cpad)),
                      inv((cpad, cpad)), inv((1, cpad)),
                      inv((cpad, cpad)), inv((1, cpad)),
                      inv((cpad, cpad)), inv((1, cpad)),
                      pl.BlockSpec(memory_space=pltpu.MemorySpace.SMEM)],
            out_specs=tok,
            scratch_shapes=[pltpu.VMEM((tm, cpad), jnp.float32)],
        ),
        compiler_params=pltpu.CompilerParams(
            dimension_semantics=("parallel",),
            vmem_limit_bytes=vmem_limit),
    )(nbr_flat, y1_full, xs,
      pp["wg_a"], pp["wg_b"], pp["bg"],
      pp["w_fc2"], pp["b_fc2"],
      pp["wl1"], pp["bl1"],
      pp["wl2"], pp["bl2"],
      pp["es"])


# --------------------------------------------------------------------------
# Parameter folding / padding
# --------------------------------------------------------------------------

def _fold_bn(conv_w, conv_b, gamma, beta, rm, rv, eps=BN_EPS):
    """Fold eval-mode BatchNorm into a preceding 1x1 conv.
    conv_w: (C_out, C_in) -> returns right-multiplication (C_in, C_out)."""
    s = gamma / jnp.sqrt(rv + eps)
    w_eff = (conv_w * s[:, None]).T
    b_eff = (conv_b - rm) * s + beta
    return w_eff, b_eff


def _effective_params(params):
    c = params["fc1_w"].shape[0]
    w_fc1, b_fc1 = _fold_bn(params["fc1_w"], params["fc1_b"], params["bn1_g"],
                            params["bn1_b"], params["bn1_rm"], params["bn1_rv"])
    w_fc2, b_fc2 = _fold_bn(params["fc2_w"], params["fc2_b"], params["bn2_g"],
                            params["bn2_b"], params["bn2_rm"], params["bn2_rv"])
    # graph-conv: Conv -> BN -> GELU (single activation), so BN folds too.
    w_g, b_g = _fold_bn(params["gconv_w"], params["gconv_b"], params["bng_g"],
                        params["bng_b"], params["bng_rm"], params["bng_rv"])
    return dict(
        w_fc1=w_fc1, b_fc1=b_fc1,
        wg_a=w_g[:c], wg_b=w_g[c:], bg=b_g,   # input channel order [x ; mr]
        w_fc2=w_fc2, b_fc2=b_fc2,
        wl1=params["ll1_w"].T, bl1=params["ll1_b"],
        es1=jnp.exp(params["ll1_scale"]),
        wl2=params["ll2_w"].T, bl2=params["ll2_b"],
        es2=jnp.exp(params["ll2_scale"]),
    )


def _pad_params(eff, cpad):
    """Zero-pad to lane-dense channel dims; weight matrices stored bf16."""
    def mat(w):
        w = jnp.pad(w.astype(jnp.float32),
                    ((0, cpad - w.shape[0]), (0, cpad - w.shape[1])))
        return w.astype(jnp.bfloat16)

    def vec(v):
        return jnp.pad(v.astype(jnp.float32), (0, cpad - v.shape[0]))[None, :]

    return dict(
        w_fc1=mat(eff["w_fc1"]), b_fc1=vec(eff["b_fc1"]),
        wg_a=mat(eff["wg_a"]), wg_b=mat(eff["wg_b"]), bg=vec(eff["bg"]),
        w_fc2=mat(eff["w_fc2"]), b_fc2=vec(eff["b_fc2"]),
        wl1=mat(eff["wl1"]), bl1=vec(eff["bl1"]),
        wl2=mat(eff["wl2"]), bl2=vec(eff["bl2"]),
        es=jnp.stack([eff["es1"], eff["es2"]]).astype(jnp.float32),
    )


# --------------------------------------------------------------------------
# kNN graph (index construction stays in plain JAX)
# --------------------------------------------------------------------------

def _knn_indices(feat, *, k, dilation):
    """Canonical ViG dense dilated kNN graph (L2-normalized features).
    TODO(synk): pairwise distances + lax.top_k stay in plain JAX."""
    fn = feat / jnp.maximum(
        jnp.sqrt(jnp.sum(feat * feat, axis=-1, keepdims=True)), 1e-12)
    sq = jnp.sum(fn * fn, axis=-1, keepdims=True)
    dist = (sq - 2.0 * jnp.einsum("bnc,bmc->bnm", fn, fn,
                                  precision=lax.Precision.HIGHEST)
            + jnp.swapaxes(sq, 1, 2))
    _, idx = lax.top_k(-dist, k * dilation)   # nearest first (includes self)
    return idx[..., ::dilation]               # (B, N, k), dilated selection


# --------------------------------------------------------------------------
# Full forward
# --------------------------------------------------------------------------

def _forward_stages(x_nchw, params, *, k=9, dilation=1, single_buffer=True):
    b, c, h, w = x_nchw.shape
    n = h * w
    m = b * n
    cpad = _round_up(c, LANE)
    # v6e/v7x MXU tiles are 256 wide: pad to 256-multiples when cheap.
    if c > LANE and (_round_up(c, 2 * LANE) - c) * 4 <= c:
        cpad = _round_up(c, 2 * LANE)

    eff = _effective_params(params)
    pp = _pad_params(eff, cpad)

    vmem_limit = _vmem_limit_bytes()
    nbuf_w = 1 if single_buffer else 2

    # VMEM budget of the (heavier) fused tail kernel decides the token tile.
    m_est = _round_up(m, 16)
    fixed = m_est * cpad * 4 * nbuf_w            # resident y1 (f32)
    fixed += 6 * cpad * cpad * 2 * nbuf_w        # six bf16 weight matrices
    fixed += 6 * cpad * 4 * nbuf_w               # f32 bias rows
    per_row = cpad * (2 * 2      # shortcut tile (bf16), double-buffered
                      + 4 * 2    # output tile (f32), double-buffered
                      + 4        # mr scratch (f32)
                      + 8 * 4)   # headroom for f32 temporaries in the body
    tm = _pick_tile_m(m, fixed_bytes=fixed, per_row_bytes=per_row,
                      vmem_limit=vmem_limit)
    mp = _round_up(m, tm)

    # 'b c h w -> b (h w) c' hoisted to the front; lane-dense layout after.
    x_tok = jnp.transpose(x_nchw.reshape(b, c, n), (0, 2, 1))
    x_flat = jnp.pad(x_tok.reshape(m, c).astype(jnp.float32),
                     ((0, mp - m), (0, cpad - c))).astype(jnp.bfloat16)

    # Grapher.fc1 (Pallas; bf16 MXU operands, f32 output kept for the gather)
    y1_flat = _fc1_pallas(x_flat, pp["w_fc1"], pp["b_fc1"], tm=tm,
                          vmem_limit=vmem_limit, single_buffer=single_buffer)

    # kNN neighbour indices (plain JAX); globalized + flattened for prefetch.
    y1 = y1_flat[:m].reshape(b, n, cpad)
    idx = _knn_indices(y1[..., :c], k=k, dilation=dilation)     # (B, N, k)
    idx_g = (idx + (jnp.arange(b, dtype=idx.dtype) * n)[:, None, None])
    idx_g = idx_g.reshape(m, k)
    nbr_flat = jnp.pad(idx_g.reshape(m * k),
                       (0, (mp - m) * k)).astype(jnp.int32)

    # Fused tail (Pallas): gather+max-relative, graph-conv + BN + GELU,
    # fc2 + BN + shortcut, expmap0, LorentzLinear x2, residual, logmap0.
    out_flat = _vig_tail_pallas(nbr_flat, y1_flat, x_flat, pp, k=k, tm=tm,
                                vmem_limit=vmem_limit,
                                single_buffer=single_buffer)

    out_tok = out_flat[:m, :c].reshape(b, n, c)
    # Module's final `x.reshape(B, C, H, W)` is a raw reshape of (B, HW, C).
    out = out_tok.reshape(b, c, h, w)
    return {"x_bf16": x_flat[:m], "y1": y1_flat[:m], "idx_g": idx_g,
            "out_tok": out_tok, "out": out, "cpad": cpad}


def vig_block_forward(x_nchw, params, *, k=9, dilation=1):
    try:
        return _forward_stages(x_nchw, params, k=k, dilation=dilation,
                               single_buffer=True)["out"]
    except Exception:
        return _forward_stages(x_nchw, params, k=k, dilation=dilation,
                               single_buffer=False)["out"]


# --------------------------------------------------------------------------
# Pure-JAX references (mirror the kernel math, incl. bf16 matmul operands)
# --------------------------------------------------------------------------

def _fc1_reference(x_bf16, pp):
    return (jnp.dot(x_bf16, pp["w_fc1"], preferred_element_type=jnp.float32)
            + pp["b_fc1"])


def _tail_reference(y1, x_bf16, idx_g, pp):
    f32, bf16 = jnp.float32, jnp.bfloat16
    cpad = y1.shape[-1]
    is_time = (jnp.arange(cpad) == 0)[None, :]

    mx = jnp.max(y1[idx_g], axis=1)
    mr = mx - y1
    g = (jnp.dot(y1.astype(bf16), pp["wg_a"], preferred_element_type=f32)
         + jnp.dot(mr.astype(bf16), pp["wg_b"], preferred_element_type=f32))
    g = _gelu(g + pp["bg"])
    gr = (jnp.dot(g.astype(bf16), pp["w_fc2"], preferred_element_type=f32)
          + pp["b_fc2"] + x_bf16.astype(f32))

    t0 = jnp.sum(jnp.where(is_time, gr, 0.0), axis=-1, keepdims=True)
    sp_sq = jnp.sum(gr * gr, axis=-1, keepdims=True) - t0 * t0
    nrm = jnp.sqrt(jnp.maximum(sp_sq, 1e-15))
    e_p, e_m = jnp.exp(nrm), jnp.exp(-nrm)
    xl = jnp.where(is_time, 0.5 * (e_p + e_m), gr * (0.5 * (e_p - e_m) / nrm))
    res = xl

    def ll(xin, wmat, bvec, es):
        hh = jnp.dot(xin.astype(bf16), wmat, preferred_element_type=f32) + bvec
        t_lin = jnp.sum(jnp.where(is_time, hh, 0.0), axis=-1, keepdims=True)
        time = es / (1.0 + jnp.exp(-t_lin)) + 1.1
        sq = jnp.maximum(
            jnp.sum(hh * hh, axis=-1, keepdims=True) - t_lin * t_lin, 1e-8)
        scl = jnp.sqrt((time * time - 1.0) / sq)
        return jnp.where(is_time, time, hh * scl)

    xl = ll(xl, pp["wl1"], pp["bl1"], pp["es"][0])
    xl = ll(xl, pp["wl2"], pp["bl2"], pp["es"][1])
    xl = xl + res

    alpha = jnp.maximum(
        jnp.sum(jnp.where(is_time, xl, 0.0), axis=-1, keepdims=True),
        1.0 + 1e-7)
    dist = jnp.log(alpha + jnp.sqrt(alpha * alpha - 1.0))
    factor = dist * lax.rsqrt(jnp.maximum(alpha * alpha - 1.0, 1e-15))
    return jnp.where(is_time, 0.0, xl * factor)


# --------------------------------------------------------------------------
# Parameters + main
# --------------------------------------------------------------------------

def make_params(key, channels):
    c = channels
    ks = list(jax.random.split(key, 24))

    def nrm(k_, shape, s=0.1):
        return s * jax.random.normal(k_, shape, jnp.float32)

    return {
        "fc1_w": nrm(ks[0], (c, c)), "fc1_b": nrm(ks[1], (c,)),
        "bn1_g": 1.0 + nrm(ks[2], (c,)), "bn1_b": nrm(ks[3], (c,)),
        "bn1_rm": nrm(ks[4], (c,)),
        "bn1_rv": 1.0 + 0.1 * jax.random.uniform(ks[5], (c,)),
        "gconv_w": nrm(ks[6], (c, 2 * c)), "gconv_b": nrm(ks[7], (c,)),
        "bng_g": 1.0 + nrm(ks[8], (c,)), "bng_b": nrm(ks[9], (c,)),
        "bng_rm": nrm(ks[10], (c,)),
        "bng_rv": 1.0 + 0.1 * jax.random.uniform(ks[11], (c,)),
        "fc2_w": nrm(ks[12], (c, c)), "fc2_b": nrm(ks[13], (c,)),
        "bn2_g": 1.0 + nrm(ks[14], (c,)), "bn2_b": nrm(ks[15], (c,)),
        "bn2_rm": nrm(ks[16], (c,)),
        "bn2_rv": 1.0 + 0.1 * jax.random.uniform(ks[17], (c,)),
        "ll1_w": nrm(ks[18], (c, c), 0.5), "ll1_b": nrm(ks[19], (c,)),
        "ll1_scale": jnp.asarray(math.log(10.0), jnp.float32),
        "ll2_w": nrm(ks[20], (c, c), 0.5), "ll2_b": nrm(ks[21], (c,)),
        "ll2_scale": jnp.asarray(math.log(10.0), jnp.float32),
    }


if __name__ == "__main__":
    B, C, H, W = 2, 4, 16, 16
    K, DILATION = 9, 1

    key = jax.random.PRNGKey(0)
    kx, kp = jax.random.split(key)
    x = jax.random.normal(kx, (B, C, H, W), jnp.float32)
    params = make_params(kp, C)

    # Single-buffered invariant operands first; silent fallback to default
    # double-buffering if this JAX build rejects pipeline_mode=Buffered(1).
    try:
        stages = _forward_stages(x, params, k=K, dilation=DILATION,
                                 single_buffer=True)
        out = jax.block_until_ready(stages["out"])
    except Exception:
        stages = _forward_stages(x, params, k=K, dilation=DILATION,
                                 single_buffer=False)
        out = jax.block_until_ready(stages["out"])

    assert out.shape == (B, C, H, W)
    assert bool(jnp.all(jnp.isfinite(out)))

    # Validate each Pallas kernel against pure-JAX math on identical inputs
    # (same bf16 rounding points, same neighbour indices).
    eff = _effective_params(params)
    pp = _pad_params(eff, int(stages["cpad"]))

    y1_ref = _fc1_reference(stages["x_bf16"], pp)
    assert bool(jnp.allclose(stages["y1"], y1_ref, atol=2e-3, rtol=2e-3)), \
        "fc1 kernel mismatch vs JAX reference"

    tail_ref = _tail_reference(stages["y1"], stages["x_bf16"],
                               stages["idx_g"], pp)
    ref_tok = tail_ref[:, :C].reshape(B, H * W, C)
    assert bool(jnp.allclose(stages["out_tok"], ref_tok,
                             atol=3e-3, rtol=3e-3)), \
        "fused tail kernel mismatch vs JAX reference"

    print("KERNEL_OK")
</pallas_src>

<mosaic_0001>
module attributes {stable_mosaic.version = 11 : i64} {
  func.func @_fc1_kernel(%arg0: i32, %arg1: memref<128x128xbf16, #tpu.memory_space<vmem>>, %arg2: memref<128x128xbf16, #tpu.memory_space<vmem>>, %arg3: memref<1x128xf32, #tpu.memory_space<vmem>>, %arg4: memref<128x128xf32, #tpu.memory_space<vmem>>) attributes {dimension_semantics = [#tpu.dimension_semantics<parallel>], iteration_bounds = array<i64: 4>, scalar_prefetch = 0 : i64, scratch_operands = 0 : i64, tpu.core_type = #tpu.core_type<tc>, window_params = [{transform_indices = @transform_0, window_bounds = array<i64: 128, 128>}, {pipeline_mode = #tpu.pipeline_mode<synchronous>, transform_indices = @transform_1, window_bounds = array<i64: 128, 128>}, {pipeline_mode = #tpu.pipeline_mode<synchronous>, transform_indices = @transform_2, window_bounds = array<i64: 1, 128>}, {transform_indices = @transform_3, window_bounds = array<i64: 128, 128>}]} {
    %c0 = arith.constant 0 : index
    %c0_0 = arith.constant 0 : index
    %0 = vector.load %arg1[%c0, %c0_0] : memref<128x128xbf16, #tpu.memory_space<vmem>>, vector<128x128xbf16>
    %c0_1 = arith.constant 0 : index
    %c0_2 = arith.constant 0 : index
    %1 = vector.load %arg2[%c0_1, %c0_2] : memref<128x128xbf16, #tpu.memory_space<vmem>>, vector<128x128xbf16>
    %cst = arith.constant dense<0.000000e+00> : vector<128x128xf32>
    %2 = tpu.matmul %0, %1, %cst {dimension_numbers = #tpu.dot_dimension_numbers<[1], [0], [0], [1], [0, 0, 1, 1], [], []>} : vector<128x128xbf16>, vector<128x128xbf16>, vector<128x128xf32> -> vector<128x128xf32>
    %c0_3 = arith.constant 0 : index
    %c0_4 = arith.constant 0 : index
    %3 = vector.load %arg3[%c0_3, %c0_4] : memref<1x128xf32, #tpu.memory_space<vmem>>, vector<1x128xf32>
    %4 = vector.broadcast %3 : vector<1x128xf32> to vector<128x128xf32>
    %5 = arith.addf %2, %4 : vector<128x128xf32>
    %c0_5 = arith.constant 0 : index
    %c0_6 = arith.constant 0 : index
    %6 = vector.load %arg4[%c0_5, %c0_6] : memref<128x128xf32, #tpu.memory_space<vmem>>, vector<128x128xf32>
    tpu.vector_store %arg4[%c0_5, %c0_6], %5 {strides = array<i32>} : memref<128x128xf32, #tpu.memory_space<vmem>>, vector<128x128xf32>,
    return
  }
  func.func @transform_0(%arg0: i32) -> (i32, i32) {
    %c0_i32 = arith.constant 0 : i32
    %c0_i32_0 = arith.constant 0 : i32
    return %arg0, %c0_i32 : i32, i32
  }
  func.func @transform_1(%arg0: i32) -> (i32, i32) {
    %c0_i32 = arith.constant 0 : i32
    %c0_i32_0 = arith.constant 0 : i32
    %c0_i32_1 = arith.constant 0 : i32
    return %c0_i32, %c0_i32_0 : i32, i32
  }
  func.func @transform_2(%arg0: i32) -> (i32, i32) {
    %c0_i32 = arith.constant 0 : i32
    %c0_i32_0 = arith.constant 0 : i32
    %c0_i32_1 = arith.constant 0 : i32
    return %c0_i32, %c0_i32_0 : i32, i32
  }
  func.func @transform_3(%arg0: i32) -> (i32, i32) {
    %c0_i32 = arith.constant 0 : i32
    %c0_i32_0 = arith.constant 0 : i32
    return %arg0, %c0_i32 : i32, i32
  }
}

module attributes {stable_mosaic.version = 11 : i64} {
  func.func @_fc1_kernel(%arg0: i32, %arg1: memref<128x128xbf16, #tpu.memory_space<vmem>>, %arg2: memref<128x128xbf16, #tpu.memory_space<vmem>>, %arg3: memref<1x128xf32, #tpu.memory_space<vmem>>, %arg4: memref<128x128xf32, #tpu.memory_space<vmem>>) attributes {dimension_semantics = [#tpu.dimension_semantics<parallel>], iteration_bounds = array<i64: 4>, scalar_prefetch = 0 : i64, scratch_operands = 0 : i64, tpu.core_type = #tpu.core_type<tc>, window_params = [{transform_indices = @transform_0, window_bounds = array<i64: 128, 128>}, {pipeline_mode = #tpu.pipeline_mode<synchronous>, transform_indices = @transform_1, window_bounds = array<i64: 128, 128>}, {pipeline_mode = #tpu.pipeline_mode<synchronous>, transform_indices = @transform_2, window_bounds = array<i64: 1, 128>}, {transform_indices = @transform_3, window_bounds = array<i64: 128, 128>}]} {
    %c0 = arith.constant 0 : index
    %c0_0 = arith.constant 0 : index
    %0 = vector.load %arg1[%c0, %c0_0] : memref<128x128xbf16, #tpu.memory_space<vmem>>, vector<128x128xbf16>
    %c0_1 = arith.constant 0 : index
    %c0_2 = arith.constant 0 : index
    %1 = vector.load %arg2[%c0_1, %c0_2] : memref<128x128xbf16, #tpu.memory_space<vmem>>, vector<128x128xbf16>
    %cst = arith.constant dense<0.000000e+00> : vector<128x128xf32>
    %2 = tpu.matmul %0, %1, %cst {dimension_numbers = #tpu.dot_dimension_numbers<[1], [0], [0], [1], [0, 0, 1, 1], [], []>} : vector<128x128xbf16>, vector<128x128xbf16>, vector<128x128xf32> -> vector<128x128xf32>
    %c0_3 = arith.constant 0 : index
    %c0_4 = arith.constant 0 : index
    %3 = vector.load %arg3[%c0_3, %c0_4] : memref<1x128xf32, #tpu.memory_space<vmem>>, vector<1x128xf32>
    %4 = vector.broadcast %3 : vector<1x128xf32> to vector<128x128xf32>
    %5 = arith.addf %2, %4 : vector<128x128xf32>
    %c0_5 = arith.constant 0 : index
    %c0_6 = arith.constant 0 : index
    %6 = vector.load %arg4[%c0_5, %c0_6] : memref<128x128xf32, #tpu.memory_space<vmem>>, vector<128x128xf32>
    tpu.vector_store %arg4[%c0_5, %c0_6], %5 {strides = array<i32>} : memref<128x128xf32, #tpu.memory_space<vmem>>, vector<128x128xf32>,
    return
  }
  func.func @transform_0(%arg0: i32) -> (i32, i32) {
    %c0_i32 = arith.constant 0 : i32
    %c0_i32_0 = arith.constant 0 : i32
    return %arg0, %c0_i32 : i32, i32
  }
  func.func @transform_1(%arg0: i32) -> (i32, i32) {
    %c0_i32 = arith.constant 0 : i32
    %c0_i32_0 = arith.constant 0 : i32
    %c0_i32_1 = arith.constant 0 : i32
    return %c0_i32, %c0_i32_0 : i32, i32
  }
  func.func @transform_2(%arg0: i32) -> (i32, i32) {
    %c0_i32 = arith.constant 0 : i32
    %c0_i32_0 = arith.constant 0 : i32
    %c0_i32_1 = arith.constant 0 : i32
    return %c0_i32, %c0_i32_0 : i32, i32
  }
  func.func @transform_3(%arg0: i32) -> (i32, i32) {
    %c0_i32 = arith.constant 0 : i32
    %c0_i32_0 = arith.constant 0 : i32
    return %arg0, %c0_i32 : i32, i32
  }
}

</mosaic_0001>

<bundles_post_ra>
// kernel: tpu_custom_call.1
= control target key start
LH: loop header
LB: loop body
LE: loop exit
PB: predicated region body
PF: predicated region fallthrough
CT: control target
= control target key end

     0   :  { %8 = vsyncpa [#allocation3], 0  ;;  %s1093_s0 = inlined_call_operand.hbm [shape: bf16[512,128], index: 0, kind: input, shape index: {}]   ;;  %s1094_s1 = inlined_call_operand.hbm [shape: bf16[128,128], index: 1, kind: input, shape index: {}]   ;;  %s1095_s2 = inlined_call_operand.vmem [shape: f32[1,128], index: 2, kind: input, shape index: {}]   ;;  %s1096_s3 = inlined_call_operand.hbm [shape: f32[512,128], index: 3, kind: output, shape index: {}]  }
   0x1   :  { %10 = vsyncpa [#allocation3 + $0x1], 0 }
   0x2   :  { %11 = vsyncpa [#allocation6], 0 }
   0x3   :  { %12 = vsyncpa [#allocation4], 0 }
   0x4   :  { %14 = vsyncpa [#allocation4 + $0x1], 0  ;;  %s879_s12 = smov 0   ;;  %s881_s13 = smov 0  }
   0x5   :  { %s883_s14 = smov 0   ;;  %s885_s15 = smov 0  }
   0x6 LB: > { %s900_s16 = sadd.s32 4294967295, %s850_s15   ;;  %s552_s17 = sadd.s32 4294967294, %s850_s15   ;;  %s850_s15 = sphi %s885_s15, %s1117_s15   ;;  %s846_s14 = sphi %s883_s14, %s1116_s14   ;;  %s842_s13 = sphi %s881_s13, %s1115_s13   ;;  %s838_s12 = sphi %s879_s12, %s1114_s12  }
   0x7   : > { %p40_p0 = scmp.ne.s32.totalorder %s842_s13, %s838_s12  ;;  %p1097_p1 = scmp.eq.s32.totalorder %s900_s16, 0 }
   0x8   : > { %p112_p3 = scmp.eq.s32.totalorder %s552_s17, 3  ;;  %p553_p5 = scmp.ge.s32.totalorder %s850_s15, 1 }
   0x9   : > { %p909_p4 = por %p1097_p1, %p40_p0  ;;  %p119_p7 = scmp.lt.s32.totalorder %s850_s15, 5 }
   0xa   : > { %p914_p6 = por %p112_p3, %p40_p0  ;;  %s852_s21 = smov [#allocation5]  }
   0xb   : > { %s1101_s18 = scalar_select %p909_p4, 1, 0 }
   0xc   : > { %s1102_s19 = scalar_select %p914_p6, 1, 0 }
   0xd   : > { %p919_p8 = pnand %p553_p5, %p119_p7  ;;  %s131_s22 = sshll.u32 %s852_s21, 4  ;;  %s132_s22 = int_to_ptr.vmem [resolvable:$true] %s131_s22 }
   0xe   : > { %s932_s24 = sadd.s32 1, %s850_s15   ;;  %s27_s25 = sadd.s32 1, %s846_s14 }
   0xf   : > { %s1103_s20 = scalar_select %p919_p8, 1, 0 }
  0x10   : > { %p659_p9 = pneg %p919_p8  ;;  %s24_s26 = ssub.s32 %s850_s15, %s932_s24 }
  0x11   : > { %s739_s27 = scalar_lea.vmem %s132_s22, 1024  ;;  %p747_p3 = scmp.lt.s32.totalorder %s132_s22, %s132_s22 }
  0x12   : > { %p927_p10 = pnand %p659_p9, %p1097_p1  ;;  %p740_p12 = scmp.ne.s32.totalorder %s132_s22, %s739_s27 }
  0x13   : > { %p748_p5 = scmp.lt.s32.totalorder %s739_s27, %s739_s27 }
  0x14   : > { %p730_p11 = pneg %p927_p10 }
  0x15   : > { %p749_p7 = por %p748_p5, %p747_p3 }
  0x16   : > { %p742_p13 = pnand %p740_p12, %p730_p11 }
  0x18   : > { %p743_p0 = pneg %p742_p13 }
  0x1a   : > { %p750_p2 = pnand %p749_p7, %p743_p0 }
  0x1c   : > { %753 = shalt.err (!%p750_p2)
}
  0x1d   : > { %s853_s28 = smov 64   ;;  %s854_s29 = smov 4  }
  0x1e   : > { %662 = dma.hbm_to_vmem [thread:$0]  (!%p927_p10), %s1094_s1, 1024, %s132_s22, [#allocation6], %s853_s28, %s853_s28, %s854_s29  }
  0x1f   : > { %p25_p2 = scmp.eq.s32.totalorder %s24_s26, 0  ;;  %p34_p9 = scmp.ne.s32.totalorder %s846_s14, %s842_s13 }
  0x20   : > { %p35_p11 = scmp.eq.s32.totalorder %s850_s15, 0  ;;  %p672_p12 = scmp.lt.s32.totalorder %s850_s15, 4 }
  0x21   : > { %s952_s5 = scalar_select %p25_p2, %s846_s14, %s27_s25  }
  0x22   : > { %p36_p13 = por %p35_p11, %p34_p9  ;;  %p1105_p0 = scmp.eq.s32.totalorder %s900_s16, 3 }
  0x23   : > { %s148_s7 = sand.u32 1, %s846_s14   ;;  %s585_s8 = sshll.u32 %s850_s15, 10 }
  0x24   : > { %p956_p3 = por %p1105_p0, %p34_p9  ;;  %s556_s9 = sshll.u32 %s148_s7, 6 }
  0x25   : > { %s965_s17 = scalar_lea.hbm %s1093_s0, %s585_s8  ;;  %s152_s21 = scalar_lea.vmem [#allocation2], %s556_s9 }
  0x26   : > { %s1106_s6 = scalar_select %p956_p3, 1, 0 }
  0x27   : > { %s159_s22 = sshll.u32 %s152_s21, 4  ;;  %p967_p10 = pnand %p672_p12, %p36_p13  ;;  %s971_s22 = int_to_ptr.vmem [resolvable:$true] %s159_s22 }
  0x28   : > { %s973_s25 = scalar_lea.sflag [#allocation3], %s148_s7  ;;  %s754_s26 = scalar_lea.hbm %s965_s17, 1024 }
  0x29   : > { %p755_p5 = scmp.ne.s32.totalorder %s965_s17, %s754_s26  ;;  %p756_p7 = pneg %p967_p10 }
  0x2a   : > { %s759_s4 = scalar_lea.hbm %s1093_s0, 4096  ;;  %p760_p11 = scmp.lt.s32.totalorder %s965_s17, %s1093_s0 }
  0x2b   : > { %p757_p2 = pnand %p756_p7, %p755_p5  ;;  %p761_p12 = scmp.lt.s32.totalorder %s759_s4, %s754_s26 }
  0x2d   : > { %p758_p9 = pneg %p757_p2  ;;  %p762_p13 = por %p761_p12, %p760_p11 }
  0x2f   : > { %p763_p0 = pnand %p762_p13, %p758_p9 }
  0x31   : > { %766 = shalt.err (!%p763_p0)
}
  0x32   : > { %s767_s7 = scalar_lea.vmem %s971_s22, 1024  ;;  %s855_s10 = smov [#allocation2]  }
  0x33   : > { %p768_p1 = scmp.ne.s32.totalorder %s971_s22, %s767_s7  ;;  %s772_s11 = sshll.u32 %s855_s10, 4  ;;  %s773_s11 = int_to_ptr.vmem [resolvable:$false] %s772_s11 }
  0x34   : > { %s774_s21 = scalar_lea.vmem %s773_s11, 2048  ;;  %p775_p2 = scmp.lt.s32.totalorder %s971_s22, %s773_s11 }
  0x35   : > { %p770_p6 = pnand %p768_p1, %p756_p7  ;;  %p776_p3 = scmp.lt.s32.totalorder %s774_s21, %s767_s7 }
  0x37   : > { %p771_p5 = pneg %p770_p6  ;;  %p777_p4 = por %p776_p3, %p775_p2 }
  0x39   : > { %p778_p8 = pnand %p777_p4, %p771_p5 }
  0x3b   : > { %781 = shalt.err (!%p778_p8)
}
  0x3c   : > { %666 = dma.hbm_to_vmem [thread:$0]  (!%p967_p10), %s965_s17, 1024, %s971_s22, %s973_s25, %s853_s28, %s853_s28, %s854_s29  }
  0x3d   : > { %p1108_p1 = scmp.ne.s32.totalorder %s1103_s20, 0 }
  0x3e   : > { %s1000_s26 = sand.u32 (!%p1108_p1), 1, %s842_s13   ;;  %p1109_p4 = scmp.ne.s32.totalorder (!%p1108_p1), %s1101_s18, 0 }
  0x3f   : > { %171 = sbr.rel (%p1108_p1) target bundleno = 328 (0x148), region = 32  ;;  %s560_s27 = sshll.u32 (!%p1108_p1), %s1000_s26, 6 }
  0x40   : > { %s174_s30 = scalar_lea.sflag (!%p1108_p1), [#allocation3], %s1000_s26  ;;  %s1004_s4 = scalar_lea.vmem (!%p1108_p1), [#allocation2], %s560_s27 }
  0x44   : > { %825 = dma.done.wait (%p1109_p4), %s174_s30, 1024  }
  0x45   : > { %827 = vsyncadd (%p1109_p4), %s174_s30, 4294966272  ;;  %p1110_p6 = scmp.eq.s32.totalorder %s900_s16, 0 }
  0x47   : > { %829 = dma.done.wait (%p1110_p6), [#allocation6], 1024   ;;  %p1111_p8 = pmov %p1110_p6 }
  0x48   : > { %v712_v0 = vld [vmem:[#allocation5 + $0x38] sm:$0xff]   ;;  %v713_v1 = vld [vmem:[#allocation5 + $0x30] sm:$0xff]   ;;  %v714_v2 = vld [vmem:[#allocation5 + $0x28] sm:$0xff]   ;;  %s562_s18 = sshll.u32 %s1000_s26, 7  ;;  %s586_s17 = sshll.u32 %s900_s16, 11 }
  0x49   : > { %831 = vsyncadd (%p1111_p8), [#allocation6], 4294966272  ;;  %603 = vmatprep.subr.bf16.mxu0 %v712_v0  ;;  %635 = vmatprep.subr.bf16.mxu1 %v712_v0  ;;  %v715_v3 = vld [vmem:[#allocation5 + $0x20] sm:$0xff]   ;;  %v716_v6 = vld [vmem:[#allocation5 + $0x18] sm:$0xff]   ;;  %s1026_s29 = scalar_lea.vmem [#allocation7], %s562_s18  ;;  %s1045_s8 = scalar_lea.hbm %s1096_s3, %s586_s17 }
  0x4a   : > { %604 = vmatpush3.bf16.msra.mxu0 %v712_v0  ;;  %643 = vmatpush3.bf16.msra.mxu1 %v712_v0  ;;  %v720_v4 = vld [vmem:[%s1004_s4] sm:$0xff]   ;;  %v717_v7 = vld [vmem:[#allocation5 + $0x10] sm:$0xff]   ;;  %v718_v8 = vld [vmem:[#allocation5 + $0x8] sm:$0xff]   ;;  %s469_s22 = sshll.u32 %s1026_s29, 4  ;;  %s456_s16 = scalar_lea.sflag [#allocation4], %s1000_s26  ;;  %s1047_s22 = int_to_ptr.vmem [resolvable:$true] %s469_s22 }
  0x4b   : > { %605 = vmatprep.subr.bf16.mxu0 %v713_v1  ;;  %636 = vmatprep.subr.bf16.mxu1 %v713_v1  ;;  %v721_v5 = vld [vmem:[%s1004_s4 + $0x20] sm:$0xff]   ;;  %v722_v10 = vld [vmem:[%s1004_s4 + $0x8] sm:$0xff]   ;;  %v724_v12 = vld [vmem:[%s1004_s4 + $0x10] sm:$0xff]   ;;  %s782_s9 = scalar_lea.vmem %s1047_s22, 2048  ;;  %p1112_p10 = scmp.ne.s32.totalorder %s1106_s6, 0 }
  0x4c   : > { %619 = vmatprep.mubr.bf16.mxu0 %v720_v4  ;;  %627 = vmatprep.mubr.bf16.mxu1 %v721_v5  ;;  %v719_v9 = vld [vmem:[#allocation5] sm:$0xff]   ;;  %v723_v11 = vld [vmem:[%s1004_s4 + $0x28] sm:$0xff]   ;;  %v725_v13 = vld [vmem:[%s1004_s4 + $0x30] sm:$0xff]   ;;  %p783_p3 = scmp.ne.s32.totalorder %s1047_s22, %s782_s9  ;;  %s856_s7 = smov [#allocation7]  }
  0x4d   : > { %v726_v14 = vld [vmem:[%s1004_s4 + $0x18] sm:$0xff]   ;;  %v563_v16 = vld [vmem:[%s1095_s2] ss:$0 sm:$0xff]  ;;  %s786_s10 = sshll.u32 %s856_s7, 4  ;;  %s787_s10 = int_to_ptr.vmem [resolvable:$false] %s786_s10 }
  0x4e   : > { %606 = vmatpush3.bf16.msra.mxu0 %v713_v1  ;;  %644 = vmatpush3.bf16.msra.mxu1 %v713_v1  ;;  %v727_v15 = vld [vmem:[%s1004_s4 + $0x38] sm:$0xff]   ;;  %p784_p7 = pnand %p783_p3, %p1112_p10  ;;  %s788_s11 = scalar_lea.vmem %s787_s10, 4096 }
  0x4f   : > { %607 = vmatprep.subr.bf16.mxu0 %v714_v2  ;;  %637 = vmatprep.subr.bf16.mxu1 %v714_v2  ;;  %p789_p11 = scmp.lt.s32.totalorder %s1047_s22, %s787_s10  ;;  %p790_p12 = scmp.lt.s32.totalorder %s788_s11, %s782_s9 }
  0x50   : > { %p785_p9 = pneg %p784_p7 }
  0x51   : > { %p791_p13 = por %p790_p12, %p789_p11 }
  0x52   : > { %608 = vmatpush3.bf16.msra.mxu0 %v714_v2  ;;  %645 = vmatpush3.bf16.msra.mxu1 %v714_v2 }
  0x53   : > { %609 = vmatprep.subr.bf16.mxu0 %v715_v3  ;;  %638 = vmatprep.subr.bf16.mxu1 %v715_v3  ;;  %p792_p0 = pnand %p791_p13, %p785_p9 }
  0x56   : > { %610 = vmatpush3.bf16.msra.mxu0 %v715_v3  ;;  %646 = vmatpush3.bf16.msra.mxu1 %v715_v3 }
  0x57   : > { %611 = vmatprep.subr.bf16.mxu0 %v716_v6  ;;  %639 = vmatprep.subr.bf16.mxu1 %v716_v6 }
  0x5a   : > { %612 = vmatpush3.bf16.msra.mxu0 %v716_v6  ;;  %647 = vmatpush3.bf16.msra.mxu1 %v716_v6 }
  0x5b   : > { %613 = vmatprep.subr.bf16.mxu0 %v717_v7  ;;  %640 = vmatprep.subr.bf16.mxu1 %v717_v7 }
  0x5e   : > { %614 = vmatpush3.bf16.msra.mxu0 %v717_v7  ;;  %648 = vmatpush3.bf16.msra.mxu1 %v717_v7 }
  0x5f   : > { %615 = vmatprep.subr.bf16.mxu0 %v718_v8  ;;  %641 = vmatprep.subr.bf16.mxu1 %v718_v8 }
  0x62   : > { %616 = vmatpush3.bf16.msra.mxu0 %v718_v8  ;;  %649 = vmatpush3.bf16.msra.mxu1 %v718_v8 }
  0x63   : > { %617 = vmatprep.subr.bf16.mxu0 %v719_v9  ;;  %642 = vmatprep.subr.bf16.mxu1 %v719_v9 }
  0x66   : > { %618 = vmatpush3.bf16.msra.mxu0 %v719_v9  ;;  %650 = vmatpush3.bf16.msra.mxu1 %v719_v9 }
  0x69   : > { %620 = vmatmul.mubr.bf16.vlgmr.msra.gmra.mxu0 %v722_v10  ;;  %628 = vmatmul.mubr.bf16.vlgmr.msra.gmra.mxu1 %v723_v11 }
  0x6a   : > { %623 = vmatprep.mubr.bf16.mxu0 %v724_v12  ;;  %631 = vmatprep.mubr.bf16.mxu1 %v725_v13 }
  0x71   : > { %624 = vmatmul.mubr.bf16.gmra.mxu0 %v726_v14  ;;  %632 = vmatmul.mubr.bf16.gmra.mxu1 %v727_v15 }
 0x129   : > { %v621_v17 = vpop.f32.mrf.mxu0  ;;  %v629_v18 = vpop.f32.mrf.mxu1 }
 0x12a   : > { %v385_v19 = vadd.f32 %v621_v17, %v563_v16  ;;  %v417_v20 = vadd.f32 %v629_v18, %v563_v16 }
 0x12b   : > { %v376_v21 = vpop.f32.mrf.mxu0  ;;  %v408_v22 = vpop.f32.mrf.mxu1 }
 0x12c   : > { %441 = vst [vmem:[%s1026_s29 + $0x10] sm:$0xff] %v385_v19  ;;  %449 = vst [vmem:[%s1026_s29 + $0x50] sm:$0xff] %v417_v20  ;;  %v377_v23 = vadd.f32 %v563_v16, %v376_v21  ;;  %v409_v24 = vadd.f32 %v563_v16, %v408_v22 }
 0x12d   : > { %v622_v25 = vpop.f32.mrf.mxu0  ;;  %v630_v26 = vpop.f32.mrf.mxu1 }
 0x12e   : > { %439 = vst [vmem:[%s1026_s29] sm:$0xff] %v377_v23  ;;  %447 = vst [vmem:[%s1026_s29 + $0x40] sm:$0xff] %v409_v24  ;;  %v388_v27 = vadd.f32 %v622_v25, %v563_v16  ;;  %v420_v28 = vadd.f32 %v630_v26, %v563_v16 }
 0x12f   : > { %v379_v29 = vpop.f32.mrf.mxu0  ;;  %v411_v30 = vpop.f32.mrf.mxu1 }
 0x130   : > { %442 = vst [vmem:[%s1026_s29 + $0x18] sm:$0xff] %v388_v27  ;;  %450 = vst [vmem:[%s1026_s29 + $0x58] sm:$0xff] %v420_v28  ;;  %v380_v31 = vadd.f32 %v563_v16, %v379_v29  ;;  %v412_v32 = vadd.f32 %v563_v16, %v411_v30 }
 0x131   : > { %v625_v33 = vpop.f32.mrf.mxu0  ;;  %v633_v34 = vpop.f32.mrf.mxu1 }
 0x132   : > { %440 = vst [vmem:[%s1026_s29 + $0x8] sm:$0xff] %v380_v31  ;;  %448 = vst [vmem:[%s1026_s29 + $0x48] sm:$0xff] %v412_v32  ;;  %v401_v35 = vadd.f32 %v625_v33, %v563_v16  ;;  %v433_v36 = vadd.f32 %v633_v34, %v563_v16 }
 0x133   : > { %v392_v37 = vpop.f32.mrf.mxu0  ;;  %v424_v38 = vpop.f32.mrf.mxu1 }
 0x134   : > { %445 = vst [vmem:[%s1026_s29 + $0x30] sm:$0xff] %v401_v35  ;;  %453 = vst [vmem:[%s1026_s29 + $0x70] sm:$0xff] %v433_v36  ;;  %v393_v39 = vadd.f32 %v563_v16, %v392_v37  ;;  %v425_v40 = vadd.f32 %v563_v16, %v424_v38 }
 0x135   : > { %v626_v41 = vpop.f32.mrf.mxu0  ;;  %v634_v42 = vpop.f32.mrf.mxu1 }
 0x136   : > { %443 = vst [vmem:[%s1026_s29 + $0x20] sm:$0xff] %v393_v39  ;;  %451 = vst [vmem:[%s1026_s29 + $0x60] sm:$0xff] %v425_v40  ;;  %v404_v43 = vadd.f32 %v626_v41, %v563_v16  ;;  %v436_v44 = vadd.f32 %v634_v42, %v563_v16 }
 0x137   : > { %v395_v45 = vpop.f32.mrf.mxu0  ;;  %v427_v46 = vpop.f32.mrf.mxu1 }
 0x138   : > { %446 = vst [vmem:[%s1026_s29 + $0x38] sm:$0xff] %v404_v43  ;;  %454 = vst [vmem:[%s1026_s29 + $0x78] sm:$0xff] %v436_v44  ;;  %v396_v47 = vadd.f32 %v563_v16, %v395_v45  ;;  %v428_v48 = vadd.f32 %v563_v16, %v427_v46 }
 0x13a   : > { %444 = vst [vmem:[%s1026_s29 + $0x28] sm:$0xff] %v396_v47  ;;  %452 = vst [vmem:[%s1026_s29 + $0x68] sm:$0xff] %v428_v48 }
 0x13b   : > { %795 = shalt.err (!%p792_p0)
}
 0x13c   : > { %s796_s21 = scalar_lea.hbm %s1045_s8, 2048  ;;  %s800_s4 = scalar_lea.hbm %s1096_s3, 8192 }
 0x13d   : > { %p797_p5 = scmp.ne.s32.totalorder %s1045_s8, %s796_s21  ;;  %p801_p4 = scmp.lt.s32.totalorder %s1045_s8, %s1096_s3 }
 0x13e   : > { %p802_p6 = scmp.lt.s32.totalorder %s800_s4, %s796_s21 }
 0x13f   : > { %p798_p2 = pnand %p797_p5, %p1112_p10 }
 0x140   : > { %p803_p8 = por %p802_p6, %p801_p4 }
 0x141   : > { %p799_p1 = pneg %p798_p2 }
 0x143   : > { %p804_p3 = pnand %p803_p8, %p799_p1 }
 0x145   : > { %807 = shalt.err (!%p804_p3)
}
 0x146   : > { %s857_s28 = smov 128   ;;  %s858_s29 = smov 8  }
 0x147   : > { %657 = dma.vmem_to_hbm [thread:$0]  (%p1112_p10), %s1047_s22, 2048, %s1045_s8, %s456_s16, %s857_s28, %s857_s28, %s858_s29  }
 0x148 PF: > { %p674_p7 = scmp.ge.s32.totalorder %s850_s15, 2  ;;  %s484_s17 = sand.u32 1, %s838_s12  }
 0x149   : > { %p1113_p9 = scmp.ne.s32.totalorder %s1102_s19, 0  ;;  %s485_s23 = scalar_lea.sflag [#allocation4], %s484_s17 }
 0x14b   : > { %p668_p11 = pnand %p674_p7, %p1113_p9 }
 0x14d   : > { %p669_p12 = pneg %p668_p11 }
 0x14f   : > { %833 = dma.done.wait (%p669_p12), %s485_s23, 2048  }
 0x150   : > { %835 = vsyncadd (%p669_p12), %s485_s23, 4294965248  ;;  %p17_p13 = scmp.ge.s32.totalorder %s932_s24, 6   ;;  %s1114_s12 = smov %s842_s13 }
 0x151   : > { %s1115_s13 = smov %s846_s14  ;;  %s1116_s14 = smov %s952_s5 }
 0x152   : > { %s1117_s15 = smov %s932_s24  ;;  %19 = sbr.rel (!%p17_p13) target bundleno = 6 (0x6), region = 81 }
 0x157   :  { %490 = vsyncpa [#allocation3], 1 }
 0x158   :  { %492 = vsyncpa [#allocation3 + $0x1], 1 }
 0x159   :  { %493 = vsyncpa [#allocation6], 1 }
 0x15a   :  { %494 = vsyncpa [#allocation4], 1 }
 0x15b   :  { %496 = vsyncpa [#allocation4 + $0x1], 1 }

// kernel: tpu_custom_call.1
= control target key start
LH: loop header
LB: loop body
LE: loop exit
PB: predicated region body
PF: predicated region fallthrough
CT: control target
= control target key end

     0   :  { %8 = vsyncpa [#allocation3], 0  ;;  %s1093_s0 = inlined_call_operand.hbm [shape: bf16[512,128], index: 0, kind: input, shape index: {}]   ;;  %s1094_s1 = inlined_call_operand.hbm [shape: bf16[128,128], index: 1, kind: input, shape index: {}]   ;;  %s1095_s2 = inlined_call_operand.vmem [shape: f32[1,128], index: 2, kind: input, shape index: {}]   ;;  %s1096_s3 = inlined_call_operand.hbm [shape: f32[512,128], index: 3, kind: output, shape index: {}]  }
   0x1   :  { %10 = vsyncpa [#allocation3 + $0x1], 0 }
   0x2   :  { %11 = vsyncpa [#allocation6], 0 }
   0x3   :  { %12 = vsyncpa [#allocation4], 0 }
   0x4   :  { %14 = vsyncpa [#allocation4 + $0x1], 0  ;;  %s879_s12 = smov 0   ;;  %s881_s13 = smov 0  }
   0x5   :  { %s883_s14 = smov 0   ;;  %s885_s15 = smov 0  }
   0x6 LB: > { %s900_s16 = sadd.s32 4294967295, %s850_s15   ;;  %s552_s17 = sadd.s32 4294967294, %s850_s15   ;;  %s850_s15 = sphi %s885_s15, %s1117_s15   ;;  %s846_s14 = sphi %s883_s14, %s1116_s14   ;;  %s842_s13 = sphi %s881_s13, %s1115_s13   ;;  %s838_s12 = sphi %s879_s12, %s1114_s12  }
   0x7   : > { %p40_p0 = scmp.ne.s32.totalorder %s842_s13, %s838_s12  ;;  %p1097_p1 = scmp.eq.s32.totalorder %s900_s16, 0 }
   0x8   : > { %p112_p3 = scmp.eq.s32.totalorder %s552_s17, 3  ;;  %p553_p5 = scmp.ge.s32.totalorder %s850_s15, 1 }
   0x9   : > { %p909_p4 = por %p1097_p1, %p40_p0  ;;  %p119_p7 = scmp.lt.s32.totalorder %s850_s15, 5 }
   0xa   : > { %p914_p6 = por %p112_p3, %p40_p0  ;;  %s852_s21 = smov [#allocation5]  }
   0xb   : > { %s1101_s18 = scalar_select %p909_p4, 1, 0 }
   0xc   : > { %s1102_s19 = scalar_select %p914_p6, 1, 0 }
   0xd   : > { %p919_p8 = pnand %p553_p5, %p119_p7  ;;  %s131_s22 = sshll.u32 %s852_s21, 4  ;;  %s132_s22 = int_to_ptr.vmem [resolvable:$true] %s131_s22 }
   0xe   : > { %s932_s24 = sadd.s32 1, %s850_s15   ;;  %s27_s25 = sadd.s32 1, %s846_s14 }
   0xf   : > { %s1103_s20 = scalar_select %p919_p8, 1, 0 }
  0x10   : > { %p659_p9 = pneg %p919_p8  ;;  %s24_s26 = ssub.s32 %s850_s15, %s932_s24 }
  0x11   : > { %s739_s27 = scalar_lea.vmem %s132_s22, 1024  ;;  %p747_p3 = scmp.lt.s32.totalorder %s132_s22, %s132_s22 }
  0x12   : > { %p927_p10 = pnand %p659_p9, %p1097_p1  ;;  %p740_p12 = scmp.ne.s32.totalorder %s132_s22, %s739_s27 }
  0x13   : > { %p748_p5 = scmp.lt.s32.totalorder %s739_s27, %s739_s27 }
  0x14   : > { %p730_p11 = pneg %p927_p10 }
  0x15   : > { %p749_p7 = por %p748_p5, %p747_p3 }
  0x16   : > { %p742_p13 = pnand %p740_p12, %p730_p11 }
  0x18   : > { %p743_p0 = pneg %p742_p13 }
  0x1a   : > { %p750_p2 = pnand %p749_p7, %p743_p0 }
  0x1c   : > { %753 = shalt.err (!%p750_p2)
}
  0x1d   : > { %s853_s28 = smov 64   ;;  %s854_s29 = smov 4  }
  0x1e   : > { %662 = dma.hbm_to_vmem [thread:$0]  (!%p927_p10), %s1094_s1, 1024, %s132_s22, [#allocation6], %s853_s28, %s853_s28, %s854_s29  }
  0x1f   : > { %p25_p2 = scmp.eq.s32.totalorder %s24_s26, 0  ;;  %p34_p9 = scmp.ne.s32.totalorder %s846_s14, %s842_s13 }
  0x20   : > { %p35_p11 = scmp.eq.s32.totalorder %s850_s15, 0  ;;  %p672_p12 = scmp.lt.s32.totalorder %s850_s15, 4 }
  0x21   : > { %s952_s5 = scalar_select %p25_p2, %s846_s14, %s27_s25  }
  0x22   : > { %p36_p13 = por %p35_p11, %p34_p9  ;;  %p1105_p0 = scmp.eq.s32.totalorder %s900_s16, 3 }
  0x23   : > { %s148_s7 = sand.u32 1, %s846_s14   ;;  %s585_s8 = sshll.u32 %s850_s15, 10 }
  0x24   : > { %p956_p3 = por %p1105_p0, %p34_p9  ;;  %s556_s9 = sshll.u32 %s148_s7, 6 }
  0x25   : > { %s965_s17 = scalar_lea.hbm %s1093_s0, %s585_s8  ;;  %s152_s21 = scalar_lea.vmem [#allocation2], %s556_s9 }
  0x26   : > { %s1106_s6 = scalar_select %p956_p3, 1, 0 }
  0x27   : > { %s159_s22 = sshll.u32 %s152_s21, 4  ;;  %p967_p10 = pnand %p672_p12, %p36_p13  ;;  %s971_s22 = int_to_ptr.vmem [resolvable:$true] %s159_s22 }
  0x28   : > { %s973_s25 = scalar_lea.sflag [#allocation3], %s148_s7  ;;  %s754_s26 = scalar_lea.hbm %s965_s17, 1024 }
  0x29   : > { %p755_p5 = scmp.ne.s32.totalorder %s965_s17, %s754_s26  ;;  %p756_p7 = pneg %p967_p10 }
  0x2a   : > { %s759_s4 = scalar_lea.hbm %s1093_s0, 4096  ;;  %p760_p11 = scmp.lt.s32.totalorder %s965_s17, %s1093_s0 }
  0x2b   : > { %p757_p2 = pnand %p756_p7, %p755_p5  ;;  %p761_p12 = scmp.lt.s32.totalorder %s759_s4, %s754_s26 }
  0x2d   : > { %p758_p9 = pneg %p757_p2  ;;  %p762_p13 = por %p761_p12, %p760_p11 }
  0x2f   : > { %p763_p0 = pnand %p762_p13, %p758_p9 }
  0x31   : > { %766 = shalt.err (!%p763_p0)
}
  0x32   : > { %s767_s7 = scalar_lea.vmem %s971_s22, 1024  ;;  %s855_s10 = smov [#allocation2]  }
  0x33   : > { %p768_p1 = scmp.ne.s32.totalorder %s971_s22, %s767_s7  ;;  %s772_s11 = sshll.u32 %s855_s10, 4  ;;  %s773_s11 = int_to_ptr.vmem [resolvable:$false] %s772_s11 }
  0x34   : > { %s774_s21 = scalar_lea.vmem %s773_s11, 2048  ;;  %p775_p2 = scmp.lt.s32.totalorder %s971_s22, %s773_s11 }
  0x35   : > { %p770_p6 = pnand %p768_p1, %p756_p7  ;;  %p776_p3 = scmp.lt.s32.totalorder %s774_s21, %s767_s7 }
  0x37   : > { %p771_p5 = pneg %p770_p6  ;;  %p777_p4 = por %p776_p3, %p775_p2 }
  0x39   : > { %p778_p8 = pnand %p777_p4, %p771_p5 }
  0x3b   : > { %781 = shalt.err (!%p778_p8)
}
  0x3c   : > { %666 = dma.hbm_to_vmem [thread:$0]  (!%p967_p10), %s965_s17, 1024, %s971_s22, %s973_s25, %s853_s28, %s853_s28, %s854_s29  }
  0x3d   : > { %p1108_p1 = scmp.ne.s32.totalorder %s1103_s20, 0 }
  0x3e   : > { %s1000_s26 = sand.u32 (!%p1108_p1), 1, %s842_s13   ;;  %p1109_p4 = scmp.ne.s32.totalorder (!%p1108_p1), %s1101_s18, 0 }
  0x3f   : > { %171 = sbr.rel (%p1108_p1) target bundleno = 328 (0x148), region = 32  ;;  %s560_s27 = sshll.u32 (!%p1108_p1), %s1000_s26, 6 }
  0x40   : > { %s174_s30 = scalar_lea.sflag (!%p1108_p1), [#allocation3], %s1000_s26  ;;  %s1004_s4 = scalar_lea.vmem (!%p1108_p1), [#allocation2], %s560_s27 }
  0x44   : > { %825 = dma.done.wait (%p1109_p4), %s174_s30, 1024  }
  0x45   : > { %827 = vsyncadd (%p1109_p4), %s174_s30, 4294966272  ;;  %p1110_p6 = scmp.eq.s32.totalorder %s900_s16, 0 }
  0x47   : > { %829 = dma.done.wait (%p1110_p6), [#allocation6], 1024   ;;  %p1111_p8 = pmov %p1110_p6 }
  0x48   : > { %v712_v0 = vld [vmem:[#allocation5 + $0x38] sm:$0xff]   ;;  %v713_v1 = vld [vmem:[#allocation5 + $0x30] sm:$0xff]   ;;  %v714_v2 = vld [vmem:[#allocation5 + $0x28] sm:$0xff]   ;;  %s562_s18 = sshll.u32 %s1000_s26, 7  ;;  %s586_s17 = sshll.u32 %s900_s16, 11 }
  0x49   : > { %831 = vsyncadd (%p1111_p8), [#allocation6], 4294966272  ;;  %603 = vmatprep.subr.bf16.mxu0 %v712_v0  ;;  %635 = vmatprep.subr.bf16.mxu1 %v712_v0  ;;  %v715_v3 = vld [vmem:[#allocation5 + $0x20] sm:$0xff]   ;;  %v716_v6 = vld [vmem:[#allocation5 + $0x18] sm:$0xff]   ;;  %s1026_s29 = scalar_lea.vmem [#allocation7], %s562_s18  ;;  %s1045_s8 = scalar_lea.hbm %s1096_s3, %s586_s17 }
  0x4a   : > { %604 = vmatpush3.bf16.msra.mxu0 %v712_v0  ;;  %643 = vmatpush3.bf16.msra.mxu1 %v712_v0  ;;  %v720_v4 = vld [vmem:[%s1004_s4] sm:$0xff]   ;;  %v717_v7 = vld [vmem:[#allocation5 + $0x10] sm:$0xff]   ;;  %v718_v8 = vld [vmem:[#allocation5 + $0x8] sm:$0xff]   ;;  %s469_s22 = sshll.u32 %s1026_s29, 4  ;;  %s456_s16 = scalar_lea.sflag [#allocation4], %s1000_s26  ;;  %s1047_s22 = int_to_ptr.vmem [resolvable:$true] %s469_s22 }
  0x4b   : > { %605 = vmatprep.subr.bf16.mxu0 %v713_v1  ;;  %636 = vmatprep.subr.bf16.mxu1 %v713_v1  ;;  %v721_v5 = vld [vmem:[%s1004_s4 + $0x20] sm:$0xff]   ;;  %v722_v10 = vld [vmem:[%s1004_s4 + $0x8] sm:$0xff]   ;;  %v724_v12 = vld [vmem:[%s1004_s4 + $0x10] sm:$0xff]   ;;  %s782_s9 = scalar_lea.vmem %s1047_s22, 2048  ;;  %p1112_p10 = scmp.ne.s32.totalorder %s1106_s6, 0 }
  0x4c   : > { %619 = vmatprep.mubr.bf16.mxu0 %v720_v4  ;;  %627 = vmatprep.mubr.bf16.mxu1 %v721_v5  ;;  %v719_v9 = vld [vmem:[#allocation5] sm:$0xff]   ;;  %v723_v11 = vld [vmem:[%s1004_s4 + $0x28] sm:$0xff]   ;;  %v725_v13 = vld [vmem:[%s1004_s4 + $0x30] sm:$0xff]   ;;  %p783_p3 = scmp.ne.s32.totalorder %s1047_s22, %s782_s9  ;;  %s856_s7 = smov [#allocation7]  }
  0x4d   : > { %v726_v14 = vld [vmem:[%s1004_s4 + $0x18] sm:$0xff]   ;;  %v563_v16 = vld [vmem:[%s1095_s2] ss:$0 sm:$0xff]  ;;  %s786_s10 = sshll.u32 %s856_s7, 4  ;;  %s787_s10 = int_to_ptr.vmem [resolvable:$false] %s786_s10 }
  0x4e   : > { %606 = vmatpush3.bf16.msra.mxu0 %v713_v1  ;;  %644 = vmatpush3.bf16.msra.mxu1 %v713_v1  ;;  %v727_v15 = vld [vmem:[%s1004_s4 + $0x38] sm:$0xff]   ;;  %p784_p7 = pnand %p783_p3, %p1112_p10  ;;  %s788_s11 = scalar_lea.vmem %s787_s10, 4096 }
  0x4f   : > { %607 = vmatprep.subr.bf16.mxu0 %v714_v2  ;;  %637 = vmatprep.subr.bf16.mxu1 %v714_v2  ;;  %p789_p11 = scmp.lt.s32.totalorder %s1047_s22, %s787_s10  ;;  %p790_p12 = scmp.lt.s32.totalorder %s788_s11, %s782_s9 }
  0x50   : > { %p785_p9 = pneg %p784_p7 }
  0x51   : > { %p791_p13 = por %p790_p12, %p789_p11 }
  0x52   : > { %608 = vmatpush3.bf16.msra.mxu0 %v714_v2  ;;  %645 = vmatpush3.bf16.msra.mxu1 %v714_v2 }
  0x53   : > { %609 = vmatprep.subr.bf16.mxu0 %v715_v3  ;;  %638 = vmatprep.subr.bf16.mxu1 %v715_v3  ;;  %p792_p0 = pnand %p791_p13, %p785_p9 }
  0x56   : > { %610 = vmatpush3.bf16.msra.mxu0 %v715_v3  ;;  %646 = vmatpush3.bf16.msra.mxu1 %v715_v3 }
  0x57   : > { %611 = vmatprep.subr.bf16.mxu0 %v716_v6  ;;  %639 = vmatprep.subr.bf16.mxu1 %v716_v6 }
  0x5a   : > { %612 = vmatpush3.bf16.msra.mxu0 %v716_v6  ;;  %647 = vmatpush3.bf16.msra.mxu1 %v716_v6 }
  0x5b   : > { %613 = vmatprep.subr.bf16.mxu0 %v717_v7  ;;  %640 = vmatprep.subr.bf16.mxu1 %v717_v7 }
  0x5e   : > { %614 = vmatpush3.bf16.msra.mxu0 %v717_v7  ;;  %648 = vmatpush3.bf16.msra.mxu1 %v717_v7 }
  0x5f   : > { %615 = vmatprep.subr.bf16.mxu0 %v718_v8  ;;  %641 = vmatprep.subr.bf16.mxu1 %v718_v8 }
  0x62   : > { %616 = vmatpush3.bf16.msra.mxu0 %v718_v8  ;;  %649 = vmatpush3.bf16.msra.mxu1 %v718_v8 }
  0x63   : > { %617 = vmatprep.subr.bf16.mxu0 %v719_v9  ;;  %642 = vmatprep.subr.bf16.mxu1 %v719_v9 }
  0x66   : > { %618 = vmatpush3.bf16.msra.mxu0 %v719_v9  ;;  %650 = vmatpush3.bf16.msra.mxu1 %v719_v9 }
  0x69   : > { %620 = vmatmul.mubr.bf16.vlgmr.msra.gmra.mxu0 %v722_v10  ;;  %628 = vmatmul.mubr.bf16.vlgmr.msra.gmra.mxu1 %v723_v11 }
  0x6a   : > { %623 = vmatprep.mubr.bf16.mxu0 %v724_v12  ;;  %631 = vmatprep.mubr.bf16.mxu1 %v725_v13 }
  0x71   : > { %624 = vmatmul.mubr.bf16.gmra.mxu0 %v726_v14  ;;  %632 = vmatmul.mubr.bf16.gmra.mxu1 %v727_v15 }
 0x129   : > { %v621_v17 = vpop.f32.mrf.mxu0  ;;  %v629_v18 = vpop.f32.mrf.mxu1 }
 0x12a   : > { %v385_v19 = vadd.f32 %v621_v17, %v563_v16  ;;  %v417_v20 = vadd.f32 %v629_v18, %v563_v16 }
 0x12b   : > { %v376_v21 = vpop.f32.mrf.mxu0  ;;  %v408_v22 = vpop.f32.mrf.mxu1 }
 0x12c   : > { %441 = vst [vmem:[%s1026_s29 + $0x10] sm:$0xff] %v385_v19  ;;  %449 = vst [vmem:[%s1026_s29 + $0x50] sm:$0xff] %v417_v20  ;;  %v377_v23 = vadd.f32 %v563_v16, %v376_v21  ;;  %v409_v24 = vadd.f32 %v563_v16, %v408_v22 }
 0x12d   : > { %v622_v25 = vpop.f32.mrf.mxu0  ;;  %v630_v26 = vpop.f32.mrf.mxu1 }
 0x12e   : > { %439 = vst [vmem:[%s1026_s29] sm:$0xff] %v377_v23  ;;  %447 = vst [vmem:[%s1026_s29 + $0x40] sm:$0xff] %v409_v24  ;;  %v388_v27 = vadd.f32 %v622_v25, %v563_v16  ;;  %v420_v28 = vadd.f32 %v630_v26, %v563_v16 }
 0x12f   : > { %v379_v29 = vpop.f32.mrf.mxu0  ;;  %v411_v30 = vpop.f32.mrf.mxu1 }
 0x130   : > { %442 = vst [vmem:[%s1026_s29 + $0x18] sm:$0xff] %v388_v27  ;;  %450 = vst [vmem:[%s1026_s29 + $0x58] sm:$0xff] %v420_v28  ;;  %v380_v31 = vadd.f32 %v563_v16, %v379_v29  ;;  %v412_v32 = vadd.f32 %v563_v16, %v411_v30 }
 0x131   : > { %v625_v33 = vpop.f32.mrf.mxu0  ;;  %v633_v34 = vpop.f32.mrf.mxu1 }
 0x132   : > { %440 = vst [vmem:[%s1026_s29 + $0x8] sm:$0xff] %v380_v31  ;;  %448 = vst [vmem:[%s1026_s29 + $0x48] sm:$0xff] %v412_v32  ;;  %v401_v35 = vadd.f32 %v625_v33, %v563_v16  ;;  %v433_v36 = vadd.f32 %v633_v34, %v563_v16 }
 0x133   : > { %v392_v37 = vpop.f32.mrf.mxu0  ;;  %v424_v38 = vpop.f32.mrf.mxu1 }
 0x134   : > { %445 = vst [vmem:[%s1026_s29 + $0x30] sm:$0xff] %v401_v35  ;;  %453 = vst [vmem:[%s1026_s29 + $0x70] sm:$0xff] %v433_v36  ;;  %v393_v39 = vadd.f32 %v563_v16, %v392_v37  ;;  %v425_v40 = vadd.f32 %v563_v16, %v424_v38 }
 0x135   : > { %v626_v41 = vpop.f32.mrf.mxu0  ;;  %v634_v42 = vpop.f32.mrf.mxu1 }
 0x136   : > { %443 = vst [vmem:[%s1026_s29 + $0x20] sm:$0xff] %v393_v39  ;;  %451 = vst [vmem:[%s1026_s29 + $0x60] sm:$0xff] %v425_v40  ;;  %v404_v43 = vadd.f32 %v626_v41, %v563_v16  ;;  %v436_v44 = vadd.f32 %v634_v42, %v563_v16 }
 0x137   : > { %v395_v45 = vpop.f32.mrf.mxu0  ;;  %v427_v46 = vpop.f32.mrf.mxu1 }
 0x138   : > { %446 = vst [vmem:[%s1026_s29 + $0x38] sm:$0xff] %v404_v43  ;;  %454 = vst [vmem:[%s1026_s29 + $0x78] sm:$0xff] %v436_v44  ;;  %v396_v47 = vadd.f32 %v563_v16, %v395_v45  ;;  %v428_v48 = vadd.f32 %v563_v16, %v427_v46 }
 0x13a   : > { %444 = vst [vmem:[%s1026_s29 + $0x28] sm:$0xff] %v396_v47  ;;  %452 = vst [vmem:[%s1026_s29 + $0x68] sm:$0xff] %v428_v48 }
 0x13b   : > { %795 = shalt.err (!%p792_p0)
}
 0x13c   : > { %s796_s21 = scalar_lea.hbm %s1045_s8, 2048  ;;  %s800_s4 = scalar_lea.hbm %s1096_s3, 8192 }
 0x13d   : > { %p797_p5 = scmp.ne.s32.totalorder %s1045_s8, %s796_s21  ;;  %p801_p4 = scmp.lt.s32.totalorder %s1045_s8, %s1096_s3 }
 0x13e   : > { %p802_p6 = scmp.lt.s32.totalorder %s800_s4, %s796_s21 }
 0x13f   : > { %p798_p2 = pnand %p797_p5, %p1112_p10 }
 0x140   : > { %p803_p8 = por %p802_p6, %p801_p4 }
 0x141   : > { %p799_p1 = pneg %p798_p2 }
 0x143   : > { %p804_p3 = pnand %p803_p8, %p799_p1 }
 0x145   : > { %807 = shalt.err (!%p804_p3)
}
 0x146   : > { %s857_s28 = smov 128   ;;  %s858_s29 = smov 8  }
 0x147   : > { %657 = dma.vmem_to_hbm [thread:$0]  (%p1112_p10), %s1047_s22, 2048, %s1045_s8, %s456_s16, %s857_s28, %s857_s28, %s858_s29  }
 0x148 PF: > { %p674_p7 = scmp.ge.s32.totalorder %s850_s15, 2  ;;  %s484_s17 = sand.u32 1, %s838_s12  }
 0x149   : > { %p1113_p9 = scmp.ne.s32.totalorder %s1102_s19, 0  ;;  %s485_s23 = scalar_lea.sflag [#allocation4], %s484_s17 }
 0x14b   : > { %p668_p11 = pnand %p674_p7, %p1113_p9 }
 0x14d   : > { %p669_p12 = pneg %p668_p11 }
 0x14f   : > { %833 = dma.done.wait (%p669_p12), %s485_s23, 2048  }
 0x150   : > { %835 = vsyncadd (%p669_p12), %s485_s23, 4294965248  ;;  %p17_p13 = scmp.ge.s32.totalorder %s932_s24, 6   ;;  %s1114_s12 = smov %s842_s13 }
 0x151   : > { %s1115_s13 = smov %s846_s14  ;;  %s1116_s14 = smov %s952_s5 }
 0x152   : > { %s1117_s15 = smov %s932_s24  ;;  %19 = sbr.rel (!%p17_p13) target bundleno = 6 (0x6), region = 81 }
 0x157   :  { %490 = vsyncpa [#allocation3], 1 }
 0x158   :  { %492 = vsyncpa [#allocation3 + $0x1], 1 }
 0x159   :  { %493 = vsyncpa [#allocation6], 1 }
 0x15a   :  { %494 = vsyncpa [#allocation4], 1 }
 0x15b   :  { %496 = vsyncpa [#allocation4 + $0x1], 1 }

</bundles_post_ra>
